<compile_context>
chip_gen: v6e
topology: v6e:2x2x1
jax: 0.10.0
libtpu: 0.0.40
codegen_flags: <defaults>
</compile_context>

<pallas_src>
import math

import jax
import jax.numpy as jnp
from jax.experimental import pallas as pl
from jax.experimental.pallas import tpu as pltpu

# ---- problem sizes (small, consistent with the module) ----------------------
E = 32            # embed_dim
B = 2             # batch
SQ = 8            # question sequence length
SVQ = 8           # visual (question) sequence length
SA = 8            # answer sequence length
SVA = 8           # visual (answer) sequence length
BN_EPS = 1e-5


# ---- in-kernel helpers -------------------------------------------------------
def _gelu(x):
    # TODO(synk): PyTorch nn.GELU() defaults to the exact erf form; erf has no guaranteed
    # Mosaic lowering, so the tanh approximation is used (max abs err ~1e-3).
    c = math.sqrt(2.0 / math.pi)
    return 0.5 * x * (1.0 + jnp.tanh(c * (x + 0.044715 * x * x * x)))


def _masked_mean(x, lens_i32):
    """Mean over the first lens[b] rows of dim 0.  x: (S, B, E), lens_i32: (1, B)."""
    s, b, _ = x.shape
    idx = jax.lax.broadcasted_iota(jnp.int32, (s, b), 0)            # (S, B)
    inv_len = 1.0 / lens_i32.astype(jnp.float32)                    # (1, B)
    w = jnp.where(idx < lens_i32, inv_len, 0.0)                     # (S, B) — mask * 1/len fused
    return jnp.sum(x * w[:, :, None], axis=0)                       # (B, E)


# ---- fused kernel ------------------------------------------------------------
def out_multi_choices_kernel(qlen_ref, alen_ref,
                             qv_ref, vq_ref, av_ref, va_ref,
                             w1_ref, b1_ref,
                             bn_w_ref, bn_b_ref, bn_m_ref, bn_v_ref,
                             w2_ref, b2_ref,
                             o_ref):
    # ---- pooling (VPU masked reduces) ----
    q_mean  = _masked_mean(qv_ref[...], qlen_ref[...])              # (B, E)
    vq_mean = jnp.mean(vq_ref[...], axis=0)                         # (B, E)
    a_mean  = _masked_mean(av_ref[...], alen_ref[...])              # (B, E)
    va_mean = jnp.mean(va_ref[...], axis=0)                         # (B, E)

    # concat -> (B, 4E) = (B, 128): lane-dense operand for the single MXU matmul
    feat = jnp.concatenate([q_mean, vq_mean, a_mean, va_mean], axis=1)

    # ---- classifier ----
    # Dropout -> Linear(4E, E) -> GELU -> BatchNorm1d (eval, running stats) -> Dropout -> Linear(E, 1)
    h = jnp.dot(feat, w1_ref[...], preferred_element_type=jnp.float32) + b1_ref[...]
    h = _gelu(h)
    h = (h - bn_m_ref[...]) * jax.lax.rsqrt(bn_v_ref[...] + BN_EPS) * bn_w_ref[...] + bn_b_ref[...]
    # Final (E -> 1) projection done on the VPU (broadcast-mul + lane reduce); an N=1 MXU
    # matmul would only pay systolic fill/drain latency for no gain.
    out = jnp.sum(h * w2_ref[...], axis=1, keepdims=True) + b2_ref[...]          # (B, 1)
    o_ref[...] = out


# ---- pallas_call wrapper -----------------------------------------------------
def _vmem_spec():
    return pl.BlockSpec(memory_space=pltpu.MemorySpace.VMEM)


def out_multi_choices(question_embedding_v, visual_embedding_qu, question_len,
                      answer_embedding_v_expand, visual_embedding_an_expand, answers_len,
                      params):
    batch = question_len.shape[0]
    args = (question_len.reshape(1, -1).astype(jnp.int32),
            answers_len.reshape(1, -1).astype(jnp.int32),
            question_embedding_v, visual_embedding_qu,
            answer_embedding_v_expand, visual_embedding_an_expand,
            params["w1"], params["b1"],
            params["bn_w"], params["bn_b"], params["bn_mean"], params["bn_var"],
            params["w2"], params["b2"])
    return pl.pallas_call(
        out_multi_choices_kernel,
        out_shape=jax.ShapeDtypeStruct((batch, 1), jnp.float32),
        in_specs=[_vmem_spec() for _ in args],
        out_specs=_vmem_spec(),
    )(*args)


# ---- deterministic parameter construction (mirrors __init__) -----------------
def _xavier_normal(key, shape):
    fan_out, fan_in = shape
    std = math.sqrt(2.0 / (fan_in + fan_out))
    return std * jax.random.normal(key, shape, jnp.float32)


def init_params(key):
    k1, k2 = jax.random.split(key)
    w1 = _xavier_normal(k1, (E, 4 * E))       # torch Linear(4E, E).weight layout (E, 4E)
    w2 = _xavier_normal(k2, (1, E))           # torch Linear(E, 1).weight layout (1, E)
    return {
        "w1": w1.T,                                        # (4E, E) so feat @ W1
        "b1": jnp.zeros((1, E), jnp.float32),              # constant_(bias, 0)
        "bn_w": jnp.ones((1, E), jnp.float32),             # constant_(weight, 1)
        "bn_b": jnp.zeros((1, E), jnp.float32),            # constant_(bias, 0)
        "bn_mean": jnp.zeros((1, E), jnp.float32),         # running_mean init
        "bn_var": jnp.ones((1, E), jnp.float32),           # running_var init
        "w2": w2,                                          # kept (1, E): applied as VPU reduce
        "b2": jnp.zeros((1, 1), jnp.float32),
    }


# ---- main --------------------------------------------------------------------
if __name__ == "__main__":
    key = jax.random.PRNGKey(0)
    kp, k1, k2, k3, k4 = jax.random.split(key, 5)
    params = init_params(kp)

    question_embedding_v       = jax.random.normal(k1, (SQ,  B, E), jnp.float32)
    visual_embedding_qu        = jax.random.normal(k2, (SVQ, B, E), jnp.float32)
    answer_embedding_v_expand  = jax.random.normal(k3, (SA,  B, E), jnp.float32)
    visual_embedding_an_expand = jax.random.normal(k4, (SVA, B, E), jnp.float32)
    question_len = jnp.array([5, 8], jnp.int32)
    answers_len  = jnp.array([3, 6], jnp.int32)

    out = jax.jit(out_multi_choices)(question_embedding_v, visual_embedding_qu, question_len,
                                     answer_embedding_v_expand, visual_embedding_an_expand,
                                     answers_len, params)
    jax.block_until_ready(out)
    assert out.shape == (B, 1) and out.dtype == jnp.float32
    assert bool(jnp.all(jnp.isfinite(out)))
    print("KERNEL_OK")
</pallas_src>

<mosaic_0001>
module attributes {stable_mosaic.version = 11 : i64} {
  func.func @out_multi_choices_kernel(%arg0: memref<1x2xi32, #tpu.memory_space<vmem>>, %arg1: memref<1x2xi32, #tpu.memory_space<vmem>>, %arg2: memref<8x2x32xf32, #tpu.memory_space<vmem>>, %arg3: memref<8x2x32xf32, #tpu.memory_space<vmem>>, %arg4: memref<8x2x32xf32, #tpu.memory_space<vmem>>, %arg5: memref<8x2x32xf32, #tpu.memory_space<vmem>>, %arg6: memref<128x32xf32, #tpu.memory_space<vmem>>, %arg7: memref<1x32xf32, #tpu.memory_space<vmem>>, %arg8: memref<1x32xf32, #tpu.memory_space<vmem>>, %arg9: memref<1x32xf32, #tpu.memory_space<vmem>>, %arg10: memref<1x32xf32, #tpu.memory_space<vmem>>, %arg11: memref<1x32xf32, #tpu.memory_space<vmem>>, %arg12: memref<1x32xf32, #tpu.memory_space<vmem>>, %arg13: memref<1x1xf32, #tpu.memory_space<vmem>>, %arg14: memref<2x1xf32, #tpu.memory_space<vmem>>) attributes {dimension_semantics = [], scalar_prefetch = 0 : i64, scratch_operands = 0 : i64, tpu.core_type = #tpu.core_type<tc>} {
    %c0 = arith.constant 0 : index
    %c0_0 = arith.constant 0 : index
    %c0_1 = arith.constant 0 : index
    %0 = vector.load %arg2[%c0, %c0_0, %c0_1] : memref<8x2x32xf32, #tpu.memory_space<vmem>>, vector<8x2x32xf32>
    %c0_2 = arith.constant 0 : index
    %c0_3 = arith.constant 0 : index
    %1 = vector.load %arg0[%c0_2, %c0_3] : memref<1x2xi32, #tpu.memory_space<vmem>>, vector<1x2xi32>
    %2 = tpu.iota {dimensions = array<i32: 0>} : vector<8x2xi32>
    %3 = arith.sitofp %1 : vector<1x2xi32> to vector<1x2xf32>
    %cst = arith.constant 1.000000e+00 : f32
    %4 = vector.broadcast %cst : f32 to vector<1x2xf32>
    %5 = arith.divf %4, %3 : vector<1x2xf32>
    %6 = vector.broadcast %1 : vector<1x2xi32> to vector<8x2xi32>
    %7 = arith.cmpi slt, %2, %6 : vector<8x2xi32>
    %cst_4 = arith.constant 0.000000e+00 : f32
    %8 = vector.shape_cast %5 : vector<1x2xf32> to vector<1x2xf32>
    %9 = vector.broadcast %8 : vector<1x2xf32> to vector<8x2xf32>
    %10 = vector.broadcast %cst_4 : f32 to vector<8x2xf32>
    %11 = arith.select %7, %9, %10 : vector<8x2xi1>, vector<8x2xf32>
    %12 = vector.shape_cast %11 : vector<8x2xf32> to vector<8x2x1xf32>
    %13 = vector.broadcast %12 : vector<8x2x1xf32> to vector<8x2x32xf32>
    %14 = arith.mulf %0, %13 : vector<8x2x32xf32>
    %cst_5 = arith.constant dense<0.000000e+00> : vector<2x32xf32>
    %15 = vector.multi_reduction <add>, %14, %cst_5 [0] : vector<8x2x32xf32> to vector<2x32xf32>
    %c0_6 = arith.constant 0 : index
    %c0_7 = arith.constant 0 : index
    %c0_8 = arith.constant 0 : index
    %16 = vector.load %arg3[%c0_6, %c0_7, %c0_8] : memref<8x2x32xf32, #tpu.memory_space<vmem>>, vector<8x2x32xf32>
    %cst_9 = arith.constant dense<0.000000e+00> : vector<2x32xf32>
    %17 = vector.multi_reduction <add>, %16, %cst_9 [0] : vector<8x2x32xf32> to vector<2x32xf32>
    %cst_10 = arith.constant 8.000000e+00 : f32
    %18 = vector.broadcast %cst_10 : f32 to vector<2x32xf32>
    %19 = arith.divf %17, %18 : vector<2x32xf32>
    %c0_11 = arith.constant 0 : index
    %c0_12 = arith.constant 0 : index
    %c0_13 = arith.constant 0 : index
    %20 = vector.load %arg4[%c0_11, %c0_12, %c0_13] : memref<8x2x32xf32, #tpu.memory_space<vmem>>, vector<8x2x32xf32>
    %c0_14 = arith.constant 0 : index
    %c0_15 = arith.constant 0 : index
    %21 = vector.load %arg1[%c0_14, %c0_15] : memref<1x2xi32, #tpu.memory_space<vmem>>, vector<1x2xi32>
    %22 = tpu.iota {dimensions = array<i32: 0>} : vector<8x2xi32>
    %23 = arith.sitofp %21 : vector<1x2xi32> to vector<1x2xf32>
    %cst_16 = arith.constant 1.000000e+00 : f32
    %24 = vector.broadcast %cst_16 : f32 to vector<1x2xf32>
    %25 = arith.divf %24, %23 : vector<1x2xf32>
    %26 = vector.broadcast %21 : vector<1x2xi32> to vector<8x2xi32>
    %27 = arith.cmpi slt, %22, %26 : vector<8x2xi32>
    %cst_17 = arith.constant 0.000000e+00 : f32
    %28 = vector.shape_cast %25 : vector<1x2xf32> to vector<1x2xf32>
    %29 = vector.broadcast %28 : vector<1x2xf32> to vector<8x2xf32>
    %30 = vector.broadcast %cst_17 : f32 to vector<8x2xf32>
    %31 = arith.select %27, %29, %30 : vector<8x2xi1>, vector<8x2xf32>
    %32 = vector.shape_cast %31 : vector<8x2xf32> to vector<8x2x1xf32>
    %33 = vector.broadcast %32 : vector<8x2x1xf32> to vector<8x2x32xf32>
    %34 = arith.mulf %20, %33 : vector<8x2x32xf32>
    %cst_18 = arith.constant dense<0.000000e+00> : vector<2x32xf32>
    %35 = vector.multi_reduction <add>, %34, %cst_18 [0] : vector<8x2x32xf32> to vector<2x32xf32>
    %c0_19 = arith.constant 0 : index
    %c0_20 = arith.constant 0 : index
    %c0_21 = arith.constant 0 : index
    %36 = vector.load %arg5[%c0_19, %c0_20, %c0_21] : memref<8x2x32xf32, #tpu.memory_space<vmem>>, vector<8x2x32xf32>
    %cst_22 = arith.constant dense<0.000000e+00> : vector<2x32xf32>
    %37 = vector.multi_reduction <add>, %36, %cst_22 [0] : vector<8x2x32xf32> to vector<2x32xf32>
    %cst_23 = arith.constant 8.000000e+00 : f32
    %38 = vector.broadcast %cst_23 : f32 to vector<2x32xf32>
    %39 = arith.divf %37, %38 : vector<2x32xf32>
    %40 = tpu.concatenate %15, %19, %35, %39 in 1 : vector<2x32xf32>, vector<2x32xf32>, vector<2x32xf32>, vector<2x32xf32> -> vector<2x128xf32>
    %c0_24 = arith.constant 0 : index
    %c0_25 = arith.constant 0 : index
    %41 = vector.load %arg6[%c0_24, %c0_25] : memref<128x32xf32, #tpu.memory_space<vmem>>, vector<128x32xf32>
    %cst_26 = arith.constant dense<0.000000e+00> : vector<2x32xf32>
    %42 = tpu.matmul %40, %41, %cst_26 {dimension_numbers = #tpu.dot_dimension_numbers<[1], [0], [0], [1], [0, 0, 1, 1], [], []>} : vector<2x128xf32>, vector<128x32xf32>, vector<2x32xf32> -> vector<2x32xf32>
    %c0_27 = arith.constant 0 : index
    %c0_28 = arith.constant 0 : index
    %43 = vector.load %arg7[%c0_27, %c0_28] : memref<1x32xf32, #tpu.memory_space<vmem>>, vector<1x32xf32>
    %44 = vector.broadcast %43 : vector<1x32xf32> to vector<2x32xf32>
    %45 = arith.addf %42, %44 : vector<2x32xf32>
    %cst_29 = arith.constant 5.000000e-01 : f32
    %46 = vector.broadcast %cst_29 : f32 to vector<2x32xf32>
    %47 = arith.mulf %46, %45 : vector<2x32xf32>
    %cst_30 = arith.constant 4.471500e-02 : f32
    %48 = vector.broadcast %cst_30 : f32 to vector<2x32xf32>
    %49 = arith.mulf %48, %45 : vector<2x32xf32>
    %50 = arith.mulf %49, %45 : vector<2x32xf32>
    %51 = arith.mulf %50, %45 : vector<2x32xf32>
    %52 = arith.addf %45, %51 : vector<2x32xf32>
    %cst_31 = arith.constant 0.797884583 : f32
    %53 = vector.broadcast %cst_31 : f32 to vector<2x32xf32>
    %54 = arith.mulf %53, %52 : vector<2x32xf32>
    %55 = math.tanh %54 : vector<2x32xf32>
    %cst_32 = arith.constant 1.000000e+00 : f32
    %56 = vector.broadcast %cst_32 : f32 to vector<2x32xf32>
    %57 = arith.addf %56, %55 : vector<2x32xf32>
    %58 = arith.mulf %47, %57 : vector<2x32xf32>
    %c0_33 = arith.constant 0 : index
    %c0_34 = arith.constant 0 : index
    %59 = vector.load %arg10[%c0_33, %c0_34] : memref<1x32xf32, #tpu.memory_space<vmem>>, vector<1x32xf32>
    %60 = vector.broadcast %59 : vector<1x32xf32> to vector<2x32xf32>
    %61 = arith.subf %58, %60 : vector<2x32xf32>
    %c0_35 = arith.constant 0 : index
    %c0_36 = arith.constant 0 : index
    %62 = vector.load %arg11[%c0_35, %c0_36] : memref<1x32xf32, #tpu.memory_space<vmem>>, vector<1x32xf32>
    %cst_37 = arith.constant 9.99999974E-6 : f32
    %63 = vector.broadcast %cst_37 : f32 to vector<1x32xf32>
    %64 = arith.addf %62, %63 : vector<1x32xf32>
    %65 = math.rsqrt %64 : vector<1x32xf32>
    %66 = vector.broadcast %65 : vector<1x32xf32> to vector<2x32xf32>
    %67 = arith.mulf %61, %66 : vector<2x32xf32>
    %c0_38 = arith.constant 0 : index
    %c0_39 = arith.constant 0 : index
    %68 = vector.load %arg8[%c0_38, %c0_39] : memref<1x32xf32, #tpu.memory_space<vmem>>, vector<1x32xf32>
    %69 = vector.broadcast %68 : vector<1x32xf32> to vector<2x32xf32>
    %70 = arith.mulf %67, %69 : vector<2x32xf32>
    %c0_40 = arith.constant 0 : index
    %c0_41 = arith.constant 0 : index
    %71 = vector.load %arg9[%c0_40, %c0_41] : memref<1x32xf32, #tpu.memory_space<vmem>>, vector<1x32xf32>
    %72 = vector.broadcast %71 : vector<1x32xf32> to vector<2x32xf32>
    %73 = arith.addf %70, %72 : vector<2x32xf32>
    %c0_42 = arith.constant 0 : index
    %c0_43 = arith.constant 0 : index
    %74 = vector.load %arg12[%c0_42, %c0_43] : memref<1x32xf32, #tpu.memory_space<vmem>>, vector<1x32xf32>
    %75 = vector.broadcast %74 : vector<1x32xf32> to vector<2x32xf32>
    %76 = arith.mulf %73, %75 : vector<2x32xf32>
    %cst_44 = arith.constant dense<0.000000e+00> : vector<2xf32>
    %77 = vector.multi_reduction <add>, %76, %cst_44 [1] : vector<2x32xf32> to vector<2xf32>
    %78 = vector.shape_cast %77 : vector<2xf32> to vector<2x1xf32>
    %c0_45 = arith.constant 0 : index
    %c0_46 = arith.constant 0 : index
    %79 = vector.load %arg13[%c0_45, %c0_46] : memref<1x1xf32, #tpu.memory_space<vmem>>, vector<1x1xf32>
    %80 = vector.broadcast %79 : vector<1x1xf32> to vector<2x1xf32>
    %81 = arith.addf %78, %80 : vector<2x1xf32>
    %c0_47 = arith.constant 0 : index
    %c0_48 = arith.constant 0 : index
    %82 = vector.load %arg14[%c0_47, %c0_48] : memref<2x1xf32, #tpu.memory_space<vmem>>, vector<2x1xf32>
    tpu.vector_store %arg14[%c0_47, %c0_48], %81 {strides = array<i32>} : memref<2x1xf32, #tpu.memory_space<vmem>>, vector<2x1xf32>,
    return
  }
}

</mosaic_0001>

<bundles_post_ra>
// kernel: out_multi_choices.1
= control target key start
LH: loop header
LB: loop body
LE: loop exit
PB: predicated region body
PF: predicated region fallthrough
CT: control target
= control target key end

     0   :  { %v58_v0 = vlaneseq  ;;  %vm139_vm0 = vcmask 254976   ;;  %v557_v54 = vmov 0.0   ;;  %s558_s29 = smov 32   ;;  %s559_s18 = smov 96   ;;  %vm560_vm3 = vmmov 0   ;;  %s906_s1 = inlined_call_operand.vmem [shape: s32[1,2], index: 1, kind: input, shape index: {}]   ;;  %s907_s0 = inlined_call_operand.vmem [shape: s32[1,2], index: 0, kind: input, shape index: {}]   ;;  %s908_s3 = inlined_call_operand.vmem [shape: f32[8,2,32], index: 3, kind: input, shape index: {}]   ;;  %s909_s5 = inlined_call_operand.vmem [shape: f32[8,2,32], index: 5, kind: input, shape index: {}]   ;;  %s910_s6 = inlined_call_operand.vmem [shape: f32[128,32], index: 6, kind: input, shape index: {}]   ;;  %s911_s4 = inlined_call_operand.vmem [shape: f32[8,2,32], index: 4, kind: input, shape index: {}]   ;;  %s912_s2 = inlined_call_operand.vmem [shape: f32[8,2,32], index: 2, kind: input, shape index: {}]   ;;  %s913_s13 = inlined_call_operand.<no memory space> [shape: f32[1,1], index: 13, kind: input, shape index: {}]   ;;  %s914_s7 = inlined_call_operand.vmem [shape: f32[1,32], index: 7, kind: input, shape index: {}]   ;;  %s915_s11 = inlined_call_operand.vmem [shape: f32[1,32], index: 11, kind: input, shape index: {}]   ;;  %s916_s10 = inlined_call_operand.vmem [shape: f32[1,32], index: 10, kind: input, shape index: {}]   ;;  %s917_s8 = inlined_call_operand.vmem [shape: f32[1,32], index: 8, kind: input, shape index: {}]   ;;  %s918_s9 = inlined_call_operand.vmem [shape: f32[1,32], index: 9, kind: input, shape index: {}]   ;;  %s919_s12 = inlined_call_operand.vmem [shape: f32[1,32], index: 12, kind: input, shape index: {}]   ;;  %s920_s14 = inlined_call_operand.vmem [shape: f32[2,1], index: 14, kind: output, shape index: {}]  }
   0x1   :  { %v188_v1 = vld [vmem:[%s906_s1] sm:$0x1]  ;;  %v156_v9 = vld [vmem:[%s908_s3 + $0x2] sm:$0x3]  ;;  %v157_v18 = vld [vmem:[%s908_s3 + $0x4] sm:$0x3]  ;;  %509 = vmatprep.subr.mxu0 %v557_v54  ;;  %541 = vmatprep.mubr.msk.f32.mxu0 %vm560_vm3, %v557_v54 }
   0x2   :  { %v189_v2 = vcvt.s32.f32 %v188_v1  ;;  %v640_v3 = vshrl.u32 %v58_v0, 7  ;;  %v57_v4 = vld [vmem:[%s907_s0] sm:$0x1]  ;;  %v164_v16 = vsel %vm139_vm0, %v156_v9, 0.0  ;;  %v284_v22 = vld [vmem:[%s909_s5 + $0x2] sm:$0x3] }
   0x3   :  { %v60_v5 = vcvt.s32.f32 %v57_v4  ;;  %v155_v8 = vld [vmem:[%s908_s3] sm:$0x3]  ;;  %v166_v28 = vsel %vm139_vm0, %v157_v18, 0.0  ;;  %v158_v29 = vld [vmem:[%s908_s3 + $0x6] sm:$0x3]  ;;  %v292_v31 = vsel %vm139_vm0, %v284_v22, 0.0 }
   0x4   :  { %549 = vrcp.f32 %v189_v2  ;;  %v646_v6 = vsub.s32 0, %v640_v3  ;;  %v91_v11 = vsub.s32 2, %v640_v3  ;;  %v84_v13 = vsub.s32 1, %v640_v3  ;;  %v283_v21 = vld [vmem:[%s909_s5] sm:$0x3]  ;;  %v340_v55 = vld [vmem:[%s910_s6 + $0x78] sm:$0xff] }
   0x5   :  { %551 = vrcp.f32 %v60_v5  ;;  %v98_v14 = vsub.s32 3, %v640_v3  ;;  %v163_v15 = vsel %vm139_vm0, %v155_v8, 0.0  ;;  %v105_v23 = vsub.s32 4, %v640_v3  ;;  %v285_v34 = vld [vmem:[%s909_s5 + $0x4] sm:$0x3]  ;;  %510 = vmatpush3.msra.mxu0 %v340_v55  ;;  %v339_v57 = vld [vmem:[%s910_s6 + $0x70] sm:$0xff] }
   0x6   :  { %v195_v7 = vrot.slane %v188_v1, %v646_v6  ;;  %v165_v24 = vadd.f32 %v164_v16, %v163_v15  ;;  %v112_v27 = vsub.s32 5, %v640_v3  ;;  %v291_v30 = vsel %vm139_vm0, %v283_v21, 0.0  ;;  %v159_v40 = vld [vmem:[%s908_s3 + $0x8] sm:$0x3]  ;;  %v286_v45 = vld [vmem:[%s909_s5 + $0x6] sm:$0x3]  ;;  %511 = vmatprep.subr.mxu0 %v557_v54 }
   0x7   :  { %v66_v33 = vrot.slane %v57_v4, %v646_v6  ;;  %v119_v35 = vsub.s32 6, %v640_v3  ;;  %v126_v36 = vsub.s32 7, %v640_v3  ;;  %v168_v41 = vsel %vm139_vm0, %v158_v29, 0.0  ;;  %v160_v52 = vld [vmem:[%s908_s3 + $0xa] sm:$0x3]  ;;  %512 = vmatpush3.msra.mxu0 %v339_v57  ;;  %v337_v5 = vld [vmem:[%s910_s6 + $0x60] sm:$0xff] }
   0x8   :  { %vm196_vm1 = vcmp.lt.s32.totalorder %v640_v3, %v195_v7  ;;  %v167_v37 = vadd.f32 %v166_v28, %v165_v24  ;;  %v293_v42 = vadd.f32 %v292_v31, %v291_v30  ;;  %v294_v44 = vsel %vm139_vm0, %v285_v34, 0.0  ;;  %v287_v56 = vld [vmem:[%s909_s5 + $0x8] sm:$0x3]  ;;  %v161_v1 = vld [vmem:[%s908_s3 + $0xc] sm:$0x3]  ;;  %513 = vmatprep.subr.mxu0 %v557_v54  ;;  %v333_v29 = vld [vmem:[%s910_s6 + $0x40] sm:$0xff] }
   0x9   :  { %vm67_vm2 = vcmp.lt.s32.totalorder %v640_v3, %v66_v33  ;;  %v170_v47 = vsel %vm139_vm0, %v159_v40, 0.0  ;;  %v296_v53 = vsel %vm139_vm0, %v286_v45, 0.0  ;;  %v172_v61 = vsel %vm139_vm0, %v160_v52, 0.0  ;;  %v338_v63 = vld [vmem:[%s910_s6 + $0x68] sm:$0xff]  ;;  %v332_v3 = vld [vmem:[%s910_s6 + $0x38] sm:$0xff] }
   0xa   :  { %v169_v46 = vadd.f32 %v168_v41, %v167_v37  ;;  %v295_v50 = vadd.f32 %v294_v44, %v293_v42  ;;  %v298_v0 = vsel %vm139_vm0, %v287_v56, 0.0  ;;  %v288_v2 = vld [vmem:[%s909_s5 + $0xa] sm:$0x3]  ;;  %514 = vmatpush3.msra.mxu0 %v338_v63  ;;  %v289_v15 = vld [vmem:[%s909_s5 + $0xc] sm:$0x3]  ;;  %v327_v37 = vld [vmem:[%s910_s6 + $0x10] sm:$0xff] }
   0xb   :  { %515 = vmatprep.subr.mxu0 %v557_v54  ;;  %v302_v21 = vsel %vm139_vm0, %v289_v15, 0.0  ;;  %v290_v22 = vld [vmem:[%s909_s5 + $0xe] sm:$0x3]  ;;  %v182_v42 = vld [vmem:[%s911_s4 + $0x4] sm:$0x3]  ;;  %vm319_vm4 = vcmask 261120  }
   0xc   :  { %v171_v58 = vadd.f32 %v170_v47, %v169_v46  ;;  %v297_v62 = vadd.f32 %v296_v53, %v295_v50  ;;  %516 = vmatpush3.msra.mxu0 %v337_v5  ;;  %v334_v24 = vld [vmem:[%s910_s6 + $0x48] sm:$0xff]  ;;  %v304_v28 = vsel %vm139_vm0, %v290_v22, 0.0  ;;  %v183_v44 = vld [vmem:[%s911_s4 + $0x6] sm:$0x3]  ;;  %vm321_vm5 = vcmask 523264  }
   0xd   :  { %517 = vmatprep.subr.mxu0 %v557_v54  ;;  %v330_v34 = vld [vmem:[%s910_s6 + $0x28] sm:$0xff]  ;;  %v325_v63 = vld [vmem:[%s910_s6] sm:$0xff]  ;;  %vm323_vm6 = vcmask 785408   ;;  %vm480_vm7 = vcmask 1024  }
   0xe   :  { %v173_v4 = vadd.f32 %v172_v61, %v171_v58  ;;  %v299_v9 = vadd.f32 %v298_v0, %v297_v62  ;;  %v185_v52 = vld [vmem:[%s911_s4 + $0xa] sm:$0x3] }
  0x11   :  { %v550_v10 = vpop.eup %549 }
  0x12   :  { %v201_v12 = vrot.slane %v550_v10, %v646_v6  ;;  %v552_v32 = vpop.eup %551  ;;  %v174_v10 = vsel %vm139_vm0, %v161_v1, 0.0  ;;  %v186_v1 = vld [vmem:[%s911_s4 + $0xc] sm:$0x3] }
  0x13   :  { %v72_v43 = vrot.slane %v552_v32, %v646_v6  ;;  %v331_v32 = vld [vmem:[%s910_s6 + $0x30] sm:$0xff] }
  0x14   :  { %v203_v17 = vsel %vm196_vm1, %v201_v12, 0.0  ;;  %v300_v12 = vsel %vm139_vm0, %v288_v2, 0.0  ;;  %v187_v2 = vld [vmem:[%s911_s4 + $0xe] sm:$0x3] }
  0x15   :  { %v207_v19 = vrot.slane %v203_v17, %v646_v6  ;;  %v221_v20 = vrot.slane %v203_v17, %v91_v11  ;;  %v214_v25 = vrot.slane %v203_v17, %v84_v13  ;;  %v228_v26 = vrot.slane %v203_v17, %v98_v14 }
  0x16   :  { %v235_v38 = vrot.slane %v203_v17, %v105_v23  ;;  %v242_v39 = vrot.slane %v203_v17, %v112_v27  ;;  %v249_v48 = vrot.slane %v203_v17, %v119_v35  ;;  %v256_v49 = vrot.slane %v203_v17, %v126_v36 }
  0x17   :  { %209 = vbcast.lane.b32.xlu0 %v207_v19, 256  ;;  %223 = vbcast.lane.b32.xlu1 %v221_v20, 256  ;;  %v74_v51 = vsel %vm67_vm2, %v72_v43, 0.0  ;;  %v175_v17 = vadd.f32 %v174_v10, %v173_v4  ;;  %v301_v18 = vadd.f32 %v300_v12, %v299_v9  ;;  %v335_v19 = vld [vmem:[%s910_s6 + $0x50] sm:$0xff]  ;;  %v181_v43 = vld [vmem:[%s911_s4 + $0x2] sm:$0x3] }
  0x18   :  { %v78_v59 = vrot.slane %v74_v51, %v646_v6  ;;  %v85_v60 = vrot.slane %v74_v51, %v84_v13  ;;  %v92_v7 = vrot.slane %v74_v51, %v91_v11  ;;  %v99_v8 = vrot.slane %v74_v51, %v98_v14  ;;  %v162_v13 = vld [vmem:[%s908_s3 + $0xe] sm:$0x3]  ;;  %v336_v11 = vld [vmem:[%s910_s6 + $0x58] sm:$0xff] }
  0x19   :  { %v106_v14 = vrot.slane %v74_v51, %v105_v23  ;;  %v113_v16 = vrot.slane %v74_v51, %v112_v27  ;;  %v176_v20 = vsel %vm139_vm0, %v162_v13, 0.0  ;;  %518 = vmatpush3.msra.mxu0 %v336_v11  ;;  %v120_v23 = vrot.slane %v74_v51, %v119_v35  ;;  %v329_v35 = vld [vmem:[%s910_s6 + $0x20] sm:$0xff] }
  0x1a   :  { %519 = vmatprep.subr.mxu0 %v557_v54  ;;  %v303_v27 = vadd.f32 %v302_v21, %v301_v18  ;;  %v49_v18 = vld [vmem:[%s912_s2] sm:$0x3] }
  0x1b   :  { %216 = vbcast.lane.b32.xlu0 %v214_v25, 256  ;;  %230 = vbcast.lane.b32.xlu1 %v228_v26, 256  ;;  %v127_v25 = vrot.slane %v74_v51, %v126_v36  ;;  %v177_v26 = vadd.f32 %v176_v20, %v175_v17  ;;  %v328_v36 = vld [vmem:[%s910_s6 + $0x18] sm:$0xff]  ;;  %v184_v51 = vld [vmem:[%s911_s4 + $0x8] sm:$0x3] }
  0x1c   :  { %520 = vmatpush3.msra.mxu0 %v335_v19  ;;  %v305_v31 = vadd.f32 %v304_v28, %v303_v27  ;;  %v50_v19 = vld [vmem:[%s912_s2 + $0x2] sm:$0x3]  ;;  %v52_v28 = vld [vmem:[%s912_s2 + $0x6] sm:$0x3] }
  0x1d   :  { %521 = vmatprep.subr.mxu0 %v557_v54  ;;  %v179_v30 = vmul.f32 0.125, %v177_v26 }
  0x1e   :  { %522 = vmatpush3.msra.mxu0 %v334_v24  ;;  %v306_v33 = vmul.f32 0.125, %v305_v31 }
  0x1f   :  { %237 = vbcast.lane.b32.xlu0 %v235_v38, 256  ;;  %244 = vbcast.lane.b32.xlu1 %v242_v39, 256  ;;  %v326_v38 = vld [vmem:[%s910_s6 + $0x8] sm:$0xff]  ;;  %v180_v39 = vld [vmem:[%s911_s4] sm:$0x3]  ;;  %s561_s4 = smov 64  }
  0x20   :  { %523 = vmatprep.subr.mxu0 %v557_v54 }
  0x21   :  { %524 = vmatpush3.msra.mxu0 %v333_v29 }
  0x22   :  { %525 = vmatprep.subr.mxu0 %v557_v54 }
  0x23   :  { %251 = vbcast.lane.b32.xlu0 %v249_v48, 256  ;;  %258 = vbcast.lane.b32.xlu1 %v256_v49, 256 }
  0x24   :  { %526 = vmatpush3.msra.mxu0 %v332_v3 }
  0x25   :  { %527 = vmatprep.subr.mxu0 %v557_v54 }
  0x26   :  { %528 = vmatpush3.msra.mxu0 %v331_v32  ;;  %v53_v32 = vld [vmem:[%s912_s2 + $0x8] sm:$0x3] }
  0x27   :  { %80 = vbcast.lane.b32.xlu0 %v78_v59, 256  ;;  %87 = vbcast.lane.b32.xlu1 %v85_v60, 256 }
  0x28   :  { %529 = vmatprep.subr.mxu0 %v557_v54 }
  0x29   :  { %530 = vmatpush3.msra.mxu0 %v330_v34 }
  0x2a   :  { %531 = vmatprep.subr.mxu0 %v557_v54 }
  0x2b   :  { %94 = vbcast.lane.b32.xlu0 %v92_v7, 256  ;;  %101 = vbcast.lane.b32.xlu1 %v99_v8, 256 }
  0x2c   :  { %532 = vmatpush3.msra.mxu0 %v329_v35 }
  0x2d   :  { %533 = vmatprep.subr.mxu0 %v557_v54 }
  0x2e   :  { %534 = vmatpush3.msra.mxu0 %v328_v36 }
  0x2f   :  { %108 = vbcast.lane.b32.xlu0 %v106_v14, 256  ;;  %115 = vbcast.lane.b32.xlu1 %v113_v16, 256 }
  0x30   :  { %535 = vmatprep.subr.mxu0 %v557_v54 }
  0x31   :  { %536 = vmatpush3.msra.mxu0 %v327_v37  ;;  %v54_v37 = vld [vmem:[%s912_s2 + $0xa] sm:$0x3] }
  0x32   :  { %537 = vmatprep.subr.mxu0 %v557_v54 }
  0x33   :  { %122 = vbcast.lane.b32.xlu0 %v120_v23, 256  ;;  %129 = vbcast.lane.b32.xlu1 %v127_v25, 256  ;;  %v51_v23 = vld [vmem:[%s912_s2 + $0x4] sm:$0x3] }
  0x34   :  { %538 = vmatpush3.msra.mxu0 %v326_v38 }
  0x35   :  { %539 = vmatprep.subr.mxu0 %v557_v54 }
  0x36   :  { %540 = vmatpush3.msra.mxu0 %v325_v63  ;;  %v486_v63 = vld [vmem:[%s914_s7] ss:$0 sm:$0xff] }
  0x37   :  { %308 = vrot.lane.b32.xlu0 %v179_v30, %s558_s29 }
  0x3b   :  { %316 = vrot.lane.b32.xlu0 %v306_v33, %s559_s18 }
  0x89   :  { %v210_v40 = vpop.permute.xlu0 %209  ;;  %v224_v41 = vpop.permute.xlu1 %223 }
  0x8a   :  { %v260_v45 = vmul.f32 %v210_v40, %v180_v39  ;;  %v262_v46 = vmul.f32 %v224_v41, %v182_v42  ;;  %v55_v42 = vld [vmem:[%s912_s2 + $0xc] sm:$0x3] }
  0x8c   :  { %v268_v53 = vsel %vm139_vm0, %v260_v45, 0.0  ;;  %v271_v56 = vsel %vm139_vm0, %v262_v46, 0.0 }
  0x8d   :  { %v217_v47 = vpop.permute.xlu0 %216  ;;  %v231_v48 = vpop.permute.xlu1 %230 }
  0x8e   :  { %v261_v49 = vmul.f32 %v217_v47, %v181_v43  ;;  %v263_v50 = vmul.f32 %v231_v48, %v183_v44  ;;  %v56_v47 = vld [vmem:[%s912_s2 + $0xe] sm:$0x3] }
  0x90   :  { %v269_v55 = vsel %vm139_vm0, %v261_v49, 0.0  ;;  %v273_v60 = vsel %vm139_vm0, %v263_v50, 0.0 }
  0x91   :  { %v270_v57 = vadd.f32 %v269_v55, %v268_v53  ;;  %v238_v58 = vpop.permute.xlu0 %237  ;;  %v245_v59 = vpop.permute.xlu1 %244 }
  0x92   :  { %v264_v61 = vmul.f32 %v238_v58, %v184_v51  ;;  %v265_v62 = vmul.f32 %v245_v59, %v185_v52 }
  0x93   :  { %v272_v0 = vadd.f32 %v271_v56, %v270_v57 }
  0x94   :  { %v275_v4 = vsel %vm139_vm0, %v264_v61, 0.0  ;;  %v277_v9 = vsel %vm139_vm0, %v265_v62, 0.0  ;;  %v19_v62 = vstv %s913_s13 }
  0x95   :  { %v274_v5 = vadd.f32 %v273_v60, %v272_v0  ;;  %v252_v7 = vpop.permute.xlu0 %251  ;;  %v259_v8 = vpop.permute.xlu1 %258  ;;  %20 = vst [vmem:[#allocation2] sm:$0x1] %v19_v62 }
  0x96   :  { %v266_v10 = vmul.f32 %v252_v7, %v186_v1  ;;  %v267_v12 = vmul.f32 %v259_v8, %v187_v2  ;;  %v435_v7 = vld [vmem:[%s915_s11] sm:$0x1] }
  0x97   :  { %v276_v13 = vadd.f32 %v275_v4, %v274_v5 }
  0x98   :  { %v279_v15 = vsel %vm139_vm0, %v266_v10, 0.0  ;;  %v281_v14 = vsel %vm139_vm0, %v267_v12, 0.0 }
  0x99   :  { %v278_v11 = vadd.f32 %v277_v9, %v276_v13  ;;  %v81_v54 = vpop.permute.xlu0 %80  ;;  %v88_v20 = vpop.permute.xlu1 %87  ;;  %v436_v9 = vadd.f32 1e-05, %v435_v7 }
  0x9a   :  { %v131_v21 = vmul.f32 %v81_v54, %v49_v18  ;;  %v132_v22 = vmul.f32 %v88_v20, %v50_v19  ;;  %v488_v19 = vld [vmem:[%s917_s8] ss:$0 sm:$0xff] }
  0x9b   :  { %v280_v16 = vadd.f32 %v279_v15, %v278_v11  ;;  %553 = vrsqrt.f32 %v436_v9 }
  0x9c   :  { %v140_v25 = vsel %vm139_vm0, %v131_v21, 0.0  ;;  %v141_v26 = vsel %vm139_vm0, %v132_v22, 0.0  ;;  %v489_v21 = vld [vmem:[%s918_s9] ss:$0 sm:$0xff] }
  0x9d   :  { %v282_v17 = vadd.f32 %v281_v14, %v280_v16  ;;  %v95_v24 = vpop.permute.xlu0 %94  ;;  %v102_v29 = vpop.permute.xlu1 %101  ;;  %v142_v30 = vadd.f32 %v141_v26, %v140_v25  ;;  %v487_v16 = vld [vmem:[%s916_s10] ss:$0 sm:$0xff] }
  0x9e   :  { %v133_v27 = vmul.f32 %v95_v24, %v51_v23  ;;  %v134_v3 = vmul.f32 %v102_v29, %v52_v28  ;;  %v490_v23 = vld [vmem:[%s919_s12] ss:$0 sm:$0xff] }
  0x9f   :  { %312 = vrot.lane.b32.xlu1 %v282_v17, %s561_s4 }
  0xa0   :  { %v143_v31 = vsel %vm139_vm0, %v133_v27, 0.0  ;;  %v145_v35 = vsel %vm139_vm0, %v134_v3, 0.0 }
  0xa1   :  { %v109_v33 = vpop.permute.xlu0 %108  ;;  %v144_v34 = vadd.f32 %v143_v31, %v142_v30  ;;  %v116_v38 = vpop.permute.xlu1 %115 }
  0xa2   :  { %v135_v36 = vmul.f32 %v109_v33, %v53_v32  ;;  %v136_v41 = vmul.f32 %v116_v38, %v54_v37 }
  0xa3   :  { %v146_v39 = vadd.f32 %v145_v35, %v144_v34 }
  0xa4   :  { %v147_v40 = vsel %vm139_vm0, %v135_v36, 0.0  ;;  %v149_v45 = vsel %vm139_vm0, %v136_v41, 0.0 }
  0xa5   :  { %v123_v43 = vpop.permute.xlu0 %122  ;;  %v148_v44 = vadd.f32 %v147_v40, %v146_v39  ;;  %v130_v48 = vpop.permute.xlu1 %129 }
  0xa6   :  { %v137_v46 = vmul.f32 %v123_v43, %v55_v42  ;;  %v138_v51 = vmul.f32 %v130_v48, %v56_v47 }
  0xa7   :  { %v150_v49 = vadd.f32 %v149_v45, %v148_v44 }
  0xa8   :  { %v151_v50 = vsel %vm139_vm0, %v137_v46, 0.0  ;;  %v153_v53 = vsel %vm139_vm0, %v138_v51, 0.0  ;;  %v554_v13 = vpop.eup %553 }
  0xa9   :  { %v152_v52 = vadd.f32 %v151_v50, %v150_v49  ;;  %v309_v55 = vpop.permute.xlu0 %308  ;;  %v442_v54 = vrot.slane %v554_v13, %v646_v6  ;;  %v491_v6 = vld [vmem:[#allocation2] ss:$0 sm:$0xff] }
  0xab   :  { %v154_v56 = vadd.f32 %v153_v53, %v152_v52 }
  0xad   :  { %v317_v57 = vpop.permute.xlu0 %316  ;;  %v320_v58 = vsel %vm319_vm4, %v154_v56, %v309_v55 }
 0x111   :  { %v313_v59 = vpop.permute.xlu1 %312 }
 0x112   :  { %v322_v60 = vsel %vm321_vm5, %v320_v58, %v313_v59 }
 0x113   :  { %v324_v61 = vsel %vm323_vm6, %v322_v60, %v317_v57 }
 0x114   :  { %542 = vmatmul.mubr.f32.vlgmr.msra.gmra.mxu0 %v324_v61 }
 0x1d4   :  { %v414_v0 = vpop.f32.mrf.mxu0 }
 0x1d5   :  { %v415_v1 = vadd.f32 %v486_v63, %v414_v0 }
 0x1d6   :  { %v543_v2 = vpop.f32.mrf.mxu0 }
 0x1d7   :  { %v419_v4 = vmul.f32 0.044715, %v415_v1  ;;  %v418_v11 = vmul.f32 0.5, %v415_v1 }
 0x1d9   :  { %v420_v5 = vmul.f32 %v419_v4, %v415_v1 }
 0x1db   :  { %v421_v8 = vmul.f32 %v420_v5, %v415_v1 }
 0x1dd   :  { %v422_v10 = vadd.f32 %v421_v8, %v415_v1 }
 0x1df   :  { %v423_v12 = vmul.f32 0.7978846, %v422_v10 }
 0x1e1   :  { %555 = vtanh.f32 %v423_v12 }
 0x1ee   :  { %v556_v15 = vpop.eup %555 }
 0x1ef   :  { %v425_v14 = vadd.f32 1.0, %v556_v15 }
 0x1f1   :  { %v426_v17 = vmul.f32 %v425_v14, %v418_v11 }
 0x1f3   :  { %v434_v18 = vsub.f32 %v426_v17, %v487_v16 }
 0x1f5   :  { %v444_v20 = vmul.f32 %v442_v54, %v434_v18 }
 0x1f7   :  { %v452_v22 = vmul.f32 %v488_v19, %v444_v20 }
 0x1f9   :  { %v460_v24 = vadd.f32 %v489_v21, %v452_v22 }
 0x1fb   :  { %v468_v25 = vmul.f32 %v490_v23, %v460_v24 }
 0x1fd   :  { %v469_v26 = vsel %vm139_vm0, %v468_v25, 0.0 }
 0x1fe   :  { %470 = vadd.xlane.f32.xlu1 %v469_v26 }
 0x287   :  { %v471_v27 = vpop.xlane.xlu1 %470 }
 0x288   :  { %v479_v28 = vadd.f32 %v491_v6, %v471_v27 }
 0x28a   :  { %481 = vst.msk [vmem:[%s920_s14] sm:$0x3] %vm480_vm7, %v479_v28 }

</bundles_post_ra>
